<compile_context>
chip_gen: v7x
topology: tpu7x:2x2x1
jax: 0.10.0
libtpu: 0.0.40
codegen_flags: <defaults>
</compile_context>

<pallas_src>
import functools

import jax
import jax.numpy as jnp
from jax import lax
from jax.experimental import pallas as pl
from jax.experimental.pallas import tpu as pltpu


def _round_up(x, m):
    return ((x + m - 1) // m) * m


def _cdiv(a, b):
    return -(-a // b)


def _make_kernel(num_hidden_layers):
    """num_hidden_layers = num_layers - 1 (Linear+ReLU blocks before the final 1-wide layer)."""

    def kernel(xi_ref, xj_ref, *refs):
        o_ref = refs[-1]            # (1, block_n) f32, lane-dense
        p = refs[:-1]               # hidden (W bf16, b f32) pairs + (w_out f32, b_out f32)

        # Elementwise product of the two endpoint embeddings in their streamed (bn, in_ch)
        # layout (f32 mul on the VPU), rounded once to bf16 for the MXU.
        prod = (xi_ref[...] * xj_ref[...]).astype(jnp.bfloat16)        # (bn, in_ch)

        # TODO(synk): training-mode dropout not implemented (inference semantics).

        # First hidden layer: contract on in_ch -> feature-major (hid, bn) directly
        # (no explicit transpose; same trans-B contraction pattern as q @ k^T).
        w0 = p[0][...]                                                  # (hid, in_ch) bf16
        b0 = p[1][...]                                                  # (hid, 1) f32
        h = lax.dot_general(w0, prod, (((1,), (1,)), ((), ())),
                            preferred_element_type=jnp.float32) + b0    # (hid, bn) f32
        h = jnp.maximum(h, 0.0)

        # Remaining hidden layers stay feature-major: W (out, in) @ h (in, bn).
        for li in range(1, num_hidden_layers):
            w = p[2 * li][...]                                          # (out, in) bf16
            b = p[2 * li + 1][...]                                      # (out, 1) f32
            h = jnp.dot(w, h.astype(jnp.bfloat16),
                        preferred_element_type=jnp.float32) + b
            h = jnp.maximum(h, 0.0)

        # Final (hidden -> 1) layer as a VPU broadcast-multiply + sublane reduction
        # (avoids an N=1 MXU matmul and yields a lane-dense (1, bn) row).
        w_out = p[-2][...]                                              # (hid, 1) f32
        b_out = p[-1][...]                                              # (1, 1)  f32
        z = jnp.sum(h * w_out, axis=0, keepdims=True) + b_out           # (1, bn) f32
        o_ref[...] = jax.nn.sigmoid(z)

    return kernel


@functools.partial(jax.jit, static_argnames=("block_n",))
def link_predictor(x_i, x_j, params, *, block_n=8192):
    """params: PyTorch-layout (W, b) per layer, flattened: W (out, in), b (out,)."""
    n, in_ch = x_i.shape
    num_layers = len(params) // 2
    w_last, b_last = params[-2], params[-1]
    out_ch, hid = w_last.shape
    # TODO(synk): kernel specialised for out_channels == 1 (link prediction head).
    assert out_ch == 1, "link_predictor kernel supports out_channels == 1 only"

    # Tile over the edge dim.  Small n -> one small tile (no OOB); otherwise lane-aligned tiles
    # with >= 2 grid steps so v7x's two TensorCores both get fed by the "parallel" axis.
    if n <= 128:
        bn = _round_up(n, 8)
    else:
        bn = _round_up(min(block_n, _cdiv(n, 2)), 128)
    num_blocks = _cdiv(n, bn)   # last block may read past n; garbage tail sliced away below

    # Kernel-side parameter layout (tiny, VMEM-resident).
    kparams = []
    for li in range(num_layers - 1):
        w, b = params[2 * li], params[2 * li + 1]
        kparams.append(w.astype(jnp.bfloat16))                  # (out, in) bf16 -> MXU
        kparams.append(b.reshape(-1, 1).astype(jnp.float32))    # (out, 1) f32 column
    kparams.append(w_last.reshape(hid, 1).astype(jnp.float32))  # (hid, 1) f32 column, VPU reduce
    kparams.append(b_last.reshape(1, 1).astype(jnp.float32))    # (1, 1) f32

    kspecs = [pl.BlockSpec(a.shape, lambda i: (0, 0)) for a in kparams]

    out = pl.pallas_call(
        _make_kernel(num_layers - 1),
        out_shape=jax.ShapeDtypeStruct((num_blocks, 1, bn), jnp.float32),
        grid_spec=pltpu.PrefetchScalarGridSpec(
            num_scalar_prefetch=0,
            grid=(num_blocks,),
            in_specs=[pl.BlockSpec((bn, in_ch), lambda i: (i, 0)),
                      pl.BlockSpec((bn, in_ch), lambda i: (i, 0))] + kspecs,
            out_specs=pl.BlockSpec((None, 1, bn), lambda i: (i, 0, 0)),
        ),
        compiler_params=pltpu.CompilerParams(
            dimension_semantics=("parallel",),      # lets v7x shard the batch grid across 2 TCs
            vmem_limit_bytes=48 * 1024 * 1024,      # <= v7x's 64 MiB; ~30 MiB used at bn=8192
        ),
    )(x_i, x_j, *kparams)

    # (num_blocks, 1, bn) lane-major slab -> (n, 1); padded tail columns are discarded here.
    return out.reshape(-1)[:n][:, None]


def init_params(key, in_channels, hidden_channels, out_channels, num_layers):
    """PyTorch nn.Linear-style init: U(-1/sqrt(fan_in), 1/sqrt(fan_in)); W stored as (out, in)."""
    dims = [in_channels] + [hidden_channels] * (num_layers - 1) + [out_channels]
    params = []
    for li in range(num_layers):
        fan_in, fan_out = dims[li], dims[li + 1]
        key, kw, kb = jax.random.split(key, 3)
        bound = 1.0 / (fan_in ** 0.5)
        w = jax.random.uniform(kw, (fan_out, fan_in), jnp.float32, -bound, bound)
        b = jax.random.uniform(kb, (fan_out,), jnp.float32, -bound, bound)
        params.extend([w, b])
    return tuple(params)


def reference(x_i, x_j, params):
    num_layers = len(params) // 2
    x = x_i * x_j
    for li in range(num_layers - 1):
        w, b = params[2 * li], params[2 * li + 1]
        x = jnp.maximum(x @ w.T + b, 0.0)
    w, b = params[-2], params[-1]
    return jax.nn.sigmoid(x @ w.T + b)


if __name__ == "__main__":
    in_channels, hidden_channels, out_channels = 32, 64, 1
    num_layers = 3          # 1 input layer + (num_layers-2) hidden + 1 output, as in PyTorch
    n_edges = 256

    key = jax.random.PRNGKey(0)
    kp, ki, kj = jax.random.split(key, 3)
    params = init_params(kp, in_channels, hidden_channels, out_channels, num_layers)
    x_i = jax.random.normal(ki, (n_edges, in_channels), jnp.float32)
    x_j = jax.random.normal(kj, (n_edges, in_channels), jnp.float32)

    # Multi-block path (n=256 -> 2 blocks of 128 via the >=2-blocks clamp).
    out = jax.block_until_ready(link_predictor(x_i, x_j, params))
    ref = reference(x_i, x_j, params)
    assert out.shape == (n_edges, out_channels)
    max_err = float(jnp.max(jnp.abs(out - ref)))
    # bf16 weights / bf16 MXU activations -> compare against the f32 reference loosely.
    assert max_err < 2e-2, f"mismatch vs JAX reference (max abs err {max_err})"

    # Partial-last-block path (n not a multiple of block_n; garbage tail sliced away).
    n2 = 300
    ki2, kj2 = jax.random.split(jax.random.PRNGKey(1))
    x_i2 = jax.random.normal(ki2, (n2, in_channels), jnp.float32)
    x_j2 = jax.random.normal(kj2, (n2, in_channels), jnp.float32)
    out2 = jax.block_until_ready(link_predictor(x_i2, x_j2, params, block_n=128))
    ref2 = reference(x_i2, x_j2, params)
    assert out2.shape == (n2, out_channels)
    max_err2 = float(jnp.max(jnp.abs(out2 - ref2)))
    assert max_err2 < 2e-2, f"mismatch vs JAX reference (max abs err {max_err2})"

    print("KERNEL_OK")
</pallas_src>

<mosaic_0001>
module attributes {stable_mosaic.version = 11 : i64} {
  func.func @kernel(%arg0: i32, %arg1: memref<128x32xf32, #tpu.memory_space<vmem>>, %arg2: memref<128x32xf32, #tpu.memory_space<vmem>>, %arg3: memref<64x32xbf16, #tpu.memory_space<vmem>>, %arg4: memref<64x1xf32, #tpu.memory_space<vmem>>, %arg5: memref<64x64xbf16, #tpu.memory_space<vmem>>, %arg6: memref<64x1xf32, #tpu.memory_space<vmem>>, %arg7: memref<64x1xf32, #tpu.memory_space<vmem>>, %arg8: memref<1x1xf32, #tpu.memory_space<vmem>>, %arg9: memref<1x1x128xf32, #tpu.memory_space<vmem>>) attributes {dimension_semantics = [#tpu.dimension_semantics<parallel>], iteration_bounds = array<i64: 2>, scalar_prefetch = 0 : i64, scratch_operands = 0 : i64, tpu.core_type = #tpu.core_type<tc>, window_params = [{transform_indices = @transform_0, window_bounds = array<i64: 128, 32>}, {transform_indices = @transform_1, window_bounds = array<i64: 128, 32>}, {pipeline_mode = #tpu.pipeline_mode<synchronous>, transform_indices = @transform_2, window_bounds = array<i64: 64, 32>}, {pipeline_mode = #tpu.pipeline_mode<synchronous>, transform_indices = @transform_3, window_bounds = array<i64: 64, 1>}, {pipeline_mode = #tpu.pipeline_mode<synchronous>, transform_indices = @transform_4, window_bounds = array<i64: 64, 64>}, {pipeline_mode = #tpu.pipeline_mode<synchronous>, transform_indices = @transform_5, window_bounds = array<i64: 64, 1>}, {pipeline_mode = #tpu.pipeline_mode<synchronous>, transform_indices = @transform_6, window_bounds = array<i64: 64, 1>}, {pipeline_mode = #tpu.pipeline_mode<synchronous>, transform_indices = @transform_7, window_bounds = array<i64: 1, 1>}, {transform_indices = @transform_8, window_bounds = array<i64: 1, 1, 128>}]} {
    %c0 = arith.constant 0 : index
    %c0_0 = arith.constant 0 : index
    %0 = vector.load %arg1[%c0, %c0_0] : memref<128x32xf32, #tpu.memory_space<vmem>>, vector<128x32xf32>
    %c0_1 = arith.constant 0 : index
    %c0_2 = arith.constant 0 : index
    %1 = vector.load %arg2[%c0_1, %c0_2] : memref<128x32xf32, #tpu.memory_space<vmem>>, vector<128x32xf32>
    %2 = arith.mulf %0, %1 : vector<128x32xf32>
    %3 = arith.truncf %2 : vector<128x32xf32> to vector<128x32xbf16>
    %c0_3 = arith.constant 0 : index
    %c0_4 = arith.constant 0 : index
    %4 = vector.load %arg3[%c0_3, %c0_4] : memref<64x32xbf16, #tpu.memory_space<vmem>>, vector<64x32xbf16>
    %c0_5 = arith.constant 0 : index
    %c0_6 = arith.constant 0 : index
    %5 = vector.load %arg4[%c0_5, %c0_6] : memref<64x1xf32, #tpu.memory_space<vmem>>, vector<64x1xf32>
    %cst = arith.constant dense<0.000000e+00> : vector<64x128xf32>
    %6 = tpu.matmul %4, %3, %cst {dimension_numbers = #tpu.dot_dimension_numbers<[1], [1], [0], [0], [0, 0, 1, 0], [], []>} : vector<64x32xbf16>, vector<128x32xbf16>, vector<64x128xf32> -> vector<64x128xf32>
    %7 = vector.broadcast %5 : vector<64x1xf32> to vector<64x128xf32>
    %8 = arith.addf %6, %7 : vector<64x128xf32>
    %cst_7 = arith.constant 0.000000e+00 : f32
    %9 = vector.broadcast %cst_7 : f32 to vector<64x128xf32>
    %10 = arith.maximumf %8, %9 : vector<64x128xf32>
    %c0_8 = arith.constant 0 : index
    %c0_9 = arith.constant 0 : index
    %11 = vector.load %arg5[%c0_8, %c0_9] : memref<64x64xbf16, #tpu.memory_space<vmem>>, vector<64x64xbf16>
    %c0_10 = arith.constant 0 : index
    %c0_11 = arith.constant 0 : index
    %12 = vector.load %arg6[%c0_10, %c0_11] : memref<64x1xf32, #tpu.memory_space<vmem>>, vector<64x1xf32>
    %13 = arith.truncf %10 : vector<64x128xf32> to vector<64x128xbf16>
    %cst_12 = arith.constant dense<0.000000e+00> : vector<64x128xf32>
    %14 = tpu.matmul %11, %13, %cst_12 {dimension_numbers = #tpu.dot_dimension_numbers<[1], [0], [0], [1], [0, 0, 1, 1], [], []>} : vector<64x64xbf16>, vector<64x128xbf16>, vector<64x128xf32> -> vector<64x128xf32>
    %15 = vector.broadcast %12 : vector<64x1xf32> to vector<64x128xf32>
    %16 = arith.addf %14, %15 : vector<64x128xf32>
    %cst_13 = arith.constant 0.000000e+00 : f32
    %17 = vector.broadcast %cst_13 : f32 to vector<64x128xf32>
    %18 = arith.maximumf %16, %17 : vector<64x128xf32>
    %c0_14 = arith.constant 0 : index
    %c0_15 = arith.constant 0 : index
    %19 = vector.load %arg7[%c0_14, %c0_15] : memref<64x1xf32, #tpu.memory_space<vmem>>, vector<64x1xf32>
    %c0_16 = arith.constant 0 : index
    %c0_17 = arith.constant 0 : index
    %20 = vector.load %arg8[%c0_16, %c0_17] : memref<1x1xf32, #tpu.memory_space<vmem>>, vector<1x1xf32>
    %21 = vector.broadcast %19 : vector<64x1xf32> to vector<64x128xf32>
    %22 = arith.mulf %18, %21 : vector<64x128xf32>
    %cst_18 = arith.constant dense<0.000000e+00> : vector<128xf32>
    %23 = vector.multi_reduction <add>, %22, %cst_18 [0] : vector<64x128xf32> to vector<128xf32>
    %24 = vector.shape_cast %23 : vector<128xf32> to vector<1x128xf32>
    %25 = vector.broadcast %20 : vector<1x1xf32> to vector<1x128xf32>
    %26 = arith.addf %24, %25 : vector<1x128xf32>
    %27 = arith.negf %26 : vector<1x128xf32>
    %28 = math.exp %27 : vector<1x128xf32>
    %cst_19 = arith.constant 1.000000e+00 : f32
    %29 = vector.broadcast %cst_19 : f32 to vector<1x128xf32>
    %30 = arith.addf %29, %28 : vector<1x128xf32>
    %31 = arith.divf %29, %30 : vector<1x128xf32>
    %c0_20 = arith.constant 0 : index
    %c0_21 = arith.constant 0 : index
    %c0_22 = arith.constant 0 : index
    %32 = vector.load %arg9[%c0_20, %c0_21, %c0_22] : memref<1x1x128xf32, #tpu.memory_space<vmem>>, vector<1x1x128xf32>
    %33 = vector.shape_cast %32 : vector<1x1x128xf32> to vector<1x128xf32>
    %34 = vector.shape_cast %31 : vector<1x128xf32> to vector<1x1x128xf32>
    tpu.vector_store %arg9[%c0_20, %c0_21, %c0_22], %34 {strides = array<i32>} : memref<1x1x128xf32, #tpu.memory_space<vmem>>, vector<1x1x128xf32>,
    return
  }
  func.func @transform_0(%arg0: i32) -> (i32, i32) {
    %c0_i32 = arith.constant 0 : i32
    %c0_i32_0 = arith.constant 0 : i32
    return %arg0, %c0_i32 : i32, i32
  }
  func.func @transform_1(%arg0: i32) -> (i32, i32) {
    %c0_i32 = arith.constant 0 : i32
    %c0_i32_0 = arith.constant 0 : i32
    return %arg0, %c0_i32 : i32, i32
  }
  func.func @transform_2(%arg0: i32) -> (i32, i32) {
    %c0_i32 = arith.constant 0 : i32
    %c0_i32_0 = arith.constant 0 : i32
    %c0_i32_1 = arith.constant 0 : i32
    return %c0_i32, %c0_i32_0 : i32, i32
  }
  func.func @transform_3(%arg0: i32) -> (i32, i32) {
    %c0_i32 = arith.constant 0 : i32
    %c0_i32_0 = arith.constant 0 : i32
    %c0_i32_1 = arith.constant 0 : i32
    return %c0_i32, %c0_i32_0 : i32, i32
  }
  func.func @transform_4(%arg0: i32) -> (i32, i32) {
    %c0_i32 = arith.constant 0 : i32
    %c0_i32_0 = arith.constant 0 : i32
    %c0_i32_1 = arith.constant 0 : i32
    return %c0_i32, %c0_i32_0 : i32, i32
  }
  func.func @transform_5(%arg0: i32) -> (i32, i32) {
    %c0_i32 = arith.constant 0 : i32
    %c0_i32_0 = arith.constant 0 : i32
    %c0_i32_1 = arith.constant 0 : i32
    return %c0_i32, %c0_i32_0 : i32, i32
  }
  func.func @transform_6(%arg0: i32) -> (i32, i32) {
    %c0_i32 = arith.constant 0 : i32
    %c0_i32_0 = arith.constant 0 : i32
    %c0_i32_1 = arith.constant 0 : i32
    return %c0_i32, %c0_i32_0 : i32, i32
  }
  func.func @transform_7(%arg0: i32) -> (i32, i32) {
    %c0_i32 = arith.constant 0 : i32
    %c0_i32_0 = arith.constant 0 : i32
    %c0_i32_1 = arith.constant 0 : i32
    return %c0_i32, %c0_i32_0 : i32, i32
  }
  func.func @transform_8(%arg0: i32) -> (i32, i32, i32) {
    %c0_i32 = arith.constant 0 : i32
    %c0_i32_0 = arith.constant 0 : i32
    %c0_i32_1 = arith.constant 0 : i32
    return %arg0, %c0_i32, %c0_i32_0 : i32, i32, i32
  }
}

</mosaic_0001>

<bundles_post_ra>
// kernel: link_predictor.1
= control target key start
LH: loop header
LB: loop body
LE: loop exit
PB: predicated region body
PF: predicated region fallthrough
CT: control target
= control target key end

     0   :  { %s1427_s0 = inlined_call_operand.vmem [shape: f32[256,32], index: 0, kind: input, shape index: {}]   ;;  %s1428_s1 = inlined_call_operand.vmem [shape: f32[256,32], index: 1, kind: input, shape index: {}]   ;;  %s1429_s2 = inlined_call_operand.vmem [shape: bf16[64,32], index: 2, kind: input, shape index: {}]   ;;  %s1430_s3 = inlined_call_operand.vmem [shape: f32[64,1], index: 3, kind: input, shape index: {}]   ;;  %s1431_s4 = inlined_call_operand.vmem [shape: bf16[64,64], index: 4, kind: input, shape index: {}]   ;;  %s1432_s5 = inlined_call_operand.vmem [shape: f32[64,1], index: 5, kind: input, shape index: {}]   ;;  %s1433_s6 = inlined_call_operand.vmem [shape: f32[64,1], index: 6, kind: input, shape index: {}]   ;;  %s1434_s7 = inlined_call_operand.<no memory space> [shape: f32[1,1], index: 7, kind: input, shape index: {}]   ;;  %s1435_s8 = inlined_call_operand.hbm [shape: f32[2,1,128], index: 8, kind: output, shape index: {}]  }
   0x1   :  { %v13_v0 = vstv %s1434_s7 }
   0x2   :  { %14 = vst [vmem:[#allocation2] sm:$0x1] %v13_v0 }
   0x3   :  { %15 = vsyncpa [#allocation4], 0 }
   0x4   :  { %17 = vsyncpa [#allocation4 + $0x1], 0  ;;  %s1169_s29 = smov 0   ;;  %s1171_s30 = smov 0  }
   0x5   :  { %s1173_s9 = smov 0   ;;  %s1175_s10 = smov 0  }
   0x6 LB: > { %s904_s7 = sadd.s32 4294967295, %s1117_s10   ;;  %s905_s11 = sadd.s32 4294967294, %s1117_s10   ;;  %s1117_s10 = sphi %s1175_s10, %s1441_s10   ;;  %s1113_s9 = sphi %s1173_s9, %s1440_s9   ;;  %s1109_s30 = sphi %s1171_s30, %s1439_s30   ;;  %s1105_s29 = sphi %s1169_s29, %s1438_s29  }
   0x7   : > { %s1192_s12 = sadd.s32 1, %s1117_s10   ;;  %s208_s13 = sadd.s32 1, %s1113_s9 }
   0x8   : > { %s205_s14 = ssub.s32 %s1117_s10, %s1192_s12  ;;  %p218_p0 = scmp.ne.s32.totalorder %s1113_s9, %s1109_s30 }
   0x9   : > { %p206_p1 = scmp.eq.s32.totalorder %s205_s14, 0  ;;  %p219_p2 = scmp.eq.s32.totalorder %s904_s7, 1 }
   0xa   : > { %p224_p3 = scmp.ne.s32.totalorder %s1109_s30, %s1105_s29  ;;  %p225_p4 = scmp.eq.s32.totalorder %s905_s11, 1 }
   0xb   : > { %s1202_s15 = scalar_select %p206_p1, %s1113_s9, %s208_s13  }
   0xc   : > { %p1204_p5 = por %p219_p2, %p218_p0  ;;  %p1208_p6 = por %p225_p4, %p224_p3 }
   0xd   : > { %p908_p7 = scmp.ge.s32.totalorder %s1117_s10, 1  ;;  %p279_p8 = scmp.lt.s32.totalorder %s1117_s10, 3 }
   0xf   : > { %p280_p9 = pnand %p908_p7, %p279_p8 }
  0x10   : > { %s1214_s18 = sshll.u32 (!%p280_p9), %s904_s7, 4  ;;  %v1043_v1 = vld [vmem:[%s1429_s2] sm:$0xff] (!%p280_p9)   ;;  %vm462_vm0 = vcmask (!%p280_p9), 261120   ;;  %v1119_v2 = vmov (!%p280_p9), 0   ;;  %v396_v4 = vld [vmem:[%s1430_s3 + $0x10] sm:$0xff] (!%p280_p9)  ;;  %v395_v5 = vld [vmem:[%s1430_s3 + $0x8] sm:$0xff] (!%p280_p9) }
  0x11   : > { %283 = sbr.rel (%p280_p9) target bundleno = 624 (0x270), region = 52  ;;  %p318_p10 = scmp.lt.s32.totalorder (!%p280_p9), %s1214_s18, 31  ;;  %969 = vmatprep.mubr.msk.bf16.mxu0 (!%p280_p9), %vm462_vm0, %v1043_v1  ;;  %1041 = vset.pattern.permute.xlu0 (!%p280_p9), %v1119_v2  ;;  %v394_v3 = vld [vmem:[%s1430_s3] sm:$0xff] (!%p280_p9)  ;;  %v397_v6 = vld [vmem:[%s1430_s3 + $0x18] sm:$0xff] (!%p280_p9)  ;;  %v399_v22 = vld [vmem:[%s1430_s3 + $0x28] sm:$0xff] (!%p280_p9)  ;;  %vm652_vm1 = vcmask (!%p280_p9), 523264  }
  0x12   : > { %1042 = vset.pattern.permute.xlu1 (!%p280_p9), %v1119_v2  ;;  %404 = vperm.xlu0 (!%p280_p9), %1041, %v394_v3   ;;  %v398_v19 = vld [vmem:[%s1430_s3 + $0x20] sm:$0xff] (!%p280_p9)  ;;  %v400_v28 = vld [vmem:[%s1430_s3 + $0x30] sm:$0xff] (!%p280_p9)  ;;  %v401_v31 = vld [vmem:[%s1430_s3 + $0x38] sm:$0xff] (!%p280_p9)  ;;  %s315_s27 = sand.u32 (!%p280_p9), 1, %s1109_s30   ;;  %s1385_s13 = scalar_lea.hbm (!%p280_p9), %s1435_s8, %s1214_s18 }
  0x13   : > { %414 = vperm.xlu1 (!%p280_p9), %1042, %v396_v4   ;;  %v580_v32 = vld [vmem:[%s1432_s5] sm:$0xff] (!%p280_p9)  ;;  %v581_v36 = vld [vmem:[%s1432_s5 + $0x8] sm:$0xff] (!%p280_p9)  ;;  %v582_v40 = vld [vmem:[%s1432_s5 + $0x10] sm:$0xff] (!%p280_p9)  ;;  %s316_s28 = scalar_lea.vmem (!%p280_p9), [#allocation3], %s315_s27  ;;  %s826_s19 = scalar_lea.sflag (!%p280_p9), [#allocation4], %s315_s27 }
  0x14   : > { %v583_v43 = vld [vmem:[%s1432_s5 + $0x18] sm:$0xff] (!%p280_p9)  ;;  %v738_v44 = vld [vmem:[%s1433_s6] sm:$0xff] (!%p280_p9)  ;;  %v739_v48 = vld [vmem:[%s1433_s6 + $0x8] sm:$0xff] (!%p280_p9) }
  0x15   : > { %v584_v52 = vld [vmem:[%s1432_s5 + $0x20] sm:$0xff] (!%p280_p9)  ;;  %v740_v55 = vld [vmem:[%s1433_s6 + $0x10] sm:$0xff] (!%p280_p9)  ;;  %v585_v56 = vld [vmem:[%s1432_s5 + $0x28] sm:$0xff] (!%p280_p9) }
  0x16   : > { %409 = vperm.xlu0 (!%p280_p9), %1041, %v395_v5   ;;  %v741_v60 = vld [vmem:[%s1433_s6 + $0x18] sm:$0xff] (!%p280_p9)  ;;  %v586_v0 = vld [vmem:[%s1432_s5 + $0x30] sm:$0xff] (!%p280_p9)  ;;  %v742_v3 = vld [vmem:[%s1433_s6 + $0x20] sm:$0xff] (!%p280_p9) }
  0x17   : > { %419 = vperm.xlu1 (!%p280_p9), %1042, %v397_v6   ;;  %v587_v4 = vld [vmem:[%s1432_s5 + $0x38] sm:$0xff] (!%p280_p9) }
  0x18   : > { %s319_s21 = scalar_select %p318_p10, %s1214_s18, 31 }
  0x1a   : > { %s910_s24 = sshll.u32 %s319_s21, 3  ;;  %424 = vperm.xlu0 %1041, %v398_v19   ;;  %s1120_s21 = smov [#allocation3]  }
  0x1b   : > { %s1231_s7 = scalar_lea.vmem %s1427_s0, %s910_s24  ;;  %s1236_s14 = scalar_lea.vmem %s1428_s1, %s910_s24  ;;  %429 = vperm.xlu1 %1042, %v399_v22  }
  0x1c   : > { %v330_v7 = vld [vmem:[%s1231_s7] sm:$0xff]  ;;  %v331_v8 = vld [vmem:[%s1231_s7 + $0x8] sm:$0xff]  ;;  %v332_v12 = vld [vmem:[%s1231_s7 + $0x10] sm:$0xff]  ;;  %s1059_s22 = sshll.u32 %s1120_s21, 4  ;;  %s1060_s22 = int_to_ptr.vmem [resolvable:$false] %s1059_s22 }
  0x1d   : > { %v346_v9 = vld [vmem:[%s1236_s14] sm:$0xff]  ;;  %v347_v10 = vld [vmem:[%s1236_s14 + $0x8] sm:$0xff]  ;;  %v333_v13 = vld [vmem:[%s1231_s7 + $0x18] sm:$0xff]  ;;  %s1061_s23 = scalar_lea.vmem %s1060_s22, 32 }
  0x1e   : > { %v362_v11 = vmul.f32 %v346_v9, %v330_v7  ;;  %v363_v14 = vmul.f32 %v347_v10, %v331_v8  ;;  %v348_v15 = vld [vmem:[%s1236_s14 + $0x10] sm:$0xff]  ;;  %v349_v16 = vld [vmem:[%s1236_s14 + $0x18] sm:$0xff]  ;;  %v334_v21 = vld [vmem:[%s1231_s7 + $0x20] sm:$0xff]  ;;  %434 = vperm.xlu0 %1041, %v400_v28  }
  0x1f   : > { %v364_v17 = vmul.f32 %v348_v15, %v332_v12  ;;  %v365_v18 = vmul.f32 %v349_v16, %v333_v13  ;;  %v335_v24 = vld [vmem:[%s1231_s7 + $0x28] sm:$0xff]  ;;  %v350_v25 = vld [vmem:[%s1236_s14 + $0x20] sm:$0xff]  ;;  %439 = vperm.xlu1 %1042, %v401_v31   ;;  %v336_v35 = vld [vmem:[%s1231_s7 + $0x30] sm:$0xff] }
  0x20   : > { %v378_v20 = vpack.c.bf16 %v363_v14, %v362_v11  ;;  %v351_v26 = vld [vmem:[%s1236_s14 + $0x28] sm:$0xff]  ;;  %v366_v29 = vmul.f32 %v350_v25, %v334_v21  ;;  %v337_v37 = vld [vmem:[%s1231_s7 + $0x38] sm:$0xff]  ;;  %v352_v38 = vld [vmem:[%s1236_s14 + $0x30] sm:$0xff] }
  0x21   : > { %v379_v23 = vpack.c.bf16 %v365_v18, %v364_v17  ;;  %v367_v30 = vmul.f32 %v351_v26, %v335_v24  ;;  %v353_v39 = vld [vmem:[%s1236_s14 + $0x38] sm:$0xff]  ;;  %v368_v41 = vmul.f32 %v352_v38, %v336_v35  ;;  %v338_v47 = vld [vmem:[%s1231_s7 + $0x40] sm:$0xff]  ;;  %v339_v49 = vld [vmem:[%s1231_s7 + $0x48] sm:$0xff] }
  0x22   : > { %993 = vmatprep.subr.msk.bf16.mxu0 %vm462_vm0, %v378_v20  ;;  %v476_v27 = vsel %vm462_vm0, %v378_v20, 0  ;;  %594 = vperm.xlu0 %1041, %v580_v32   ;;  %v369_v42 = vmul.f32 %v353_v39, %v337_v37  ;;  %v354_v50 = vld [vmem:[%s1236_s14 + $0x40] sm:$0xff]  ;;  %v355_v51 = vld [vmem:[%s1236_s14 + $0x48] sm:$0xff]  ;;  %v340_v59 = vld [vmem:[%s1231_s7 + $0x50] sm:$0xff] }
  0x23   : > { %954 = vmatpush3.bf16.xpose.msra.mxu0 %v476_v27  ;;  %v479_v33 = vsel %vm462_vm0, %v379_v23, 0  ;;  %v380_v34 = vpack.c.bf16 %v367_v30, %v366_v29  ;;  %599 = vperm.xlu1 %1042, %v581_v36   ;;  %v370_v53 = vmul.f32 %v354_v50, %v338_v47  ;;  %v371_v54 = vmul.f32 %v355_v51, %v339_v49  ;;  %v341_v61 = vld [vmem:[%s1231_s7 + $0x58] sm:$0xff]  ;;  %v356_v62 = vld [vmem:[%s1236_s14 + $0x50] sm:$0xff]  ;;  %v342_v7 = vld [vmem:[%s1231_s7 + $0x60] sm:$0xff] }
  0x24   : > { %994 = vmatprep.subr.msk.bf16.mxu0 %vm462_vm0, %v379_v23  ;;  %v381_v46 = vpack.c.bf16 %v369_v42, %v368_v41  ;;  %v357_v63 = vld [vmem:[%s1236_s14 + $0x58] sm:$0xff]  ;;  %v372_v1 = vmul.f32 %v356_v62, %v340_v59  ;;  %v743_v8 = vld [vmem:[%s1433_s6 + $0x28] sm:$0xff]  ;;  %v358_v10 = vld [vmem:[%s1236_s14 + $0x60] sm:$0xff] }
  0x25   : > { %v482_v45 = vsel %vm462_vm0, %v380_v34, 0  ;;  %v382_v58 = vpack.c.bf16 %v371_v54, %v370_v53  ;;  %v373_v2 = vmul.f32 %v357_v63, %v341_v61  ;;  %v343_v9 = vld [vmem:[%s1231_s7 + $0x68] sm:$0xff]  ;;  %v744_v12 = vld [vmem:[%s1433_s6 + $0x30] sm:$0xff]  ;;  %v374_v13 = vmul.f32 %v358_v10, %v342_v7  ;;  %v745_v15 = vld [vmem:[%s1433_s6 + $0x38] sm:$0xff] }
  0x26   : > { %604 = vperm.xlu0 %1041, %v582_v40   ;;  %v485_v57 = vsel %vm462_vm0, %v381_v46, 0  ;;  %v359_v11 = vld [vmem:[%s1236_s14 + $0x68] sm:$0xff]  ;;  %v746_v16 = vld [vmem:[#allocation2] sm:$0x1]  ;;  %v344_v19 = vld [vmem:[%s1231_s7 + $0x70] sm:$0xff] }
  0x27   : > { %609 = vperm.xlu1 %1042, %v583_v43   ;;  %v488_v5 = vsel %vm462_vm0, %v382_v58, 0  ;;  %v383_v6 = vpack.c.bf16 %v373_v2, %v372_v1  ;;  %v375_v14 = vmul.f32 %v359_v11, %v343_v9  ;;  %v345_v20 = vld [vmem:[%s1231_s7 + $0x78] sm:$0xff]  ;;  %v360_v21 = vld [vmem:[%s1236_s14 + $0x70] sm:$0xff]  ;;  %v1044_v28 = vld [vmem:[%s1429_s2 + $0x8] sm:$0xff]   ;;  %s838_s7 = sshll.u32 %s316_s28, 4  ;;  %s1387_s7 = int_to_ptr.vmem [resolvable:$true] %s838_s7 }
  0x28   : > { %v361_v22 = vld [vmem:[%s1236_s14 + $0x78] sm:$0xff]  ;;  %v376_v23 = vmul.f32 %v360_v21, %v344_v19  ;;  %v1045_v29 = vld [vmem:[%s1429_s2 + $0x10] sm:$0xff]   ;;  %v1047_v31 = vld [vmem:[%s1431_s4] sm:$0xff]   ;;  %s1055_s20 = scalar_lea.vmem %s1387_s7, 16  ;;  %p1062_p0 = scmp.lt.s32.totalorder %s1387_s7, %s1060_s22 }
  0x29   : > { %v491_v17 = vsel %vm462_vm0, %v383_v6, 0  ;;  %v384_v18 = vpack.c.bf16 %v375_v14, %v374_v13  ;;  %v377_v24 = vmul.f32 %v361_v22, %v345_v20  ;;  %v1046_v30 = vld [vmem:[%s1429_s2 + $0x18] sm:$0xff]   ;;  %985 = vmatprep.mubr.msk.bf16.mxu1 %vm652_vm1, %v1047_v31  ;;  %p1056_p11 = scmp.ne.s32.totalorder %s1387_s7, %s1055_s20  ;;  %p1063_p1 = scmp.lt.s32.totalorder %s1061_s23, %s1055_s20 }
  0x2a   : > { %749 = vperm.xlu0 %1041, %v738_v44  }
  0x2b   : > { %956 = vmatpush3.bf16.xpose.msra.mxu0 %v479_v33  ;;  %754 = vperm.xlu1 %1042, %v739_v48   ;;  %v494_v25 = vsel %vm462_vm0, %v384_v18, 0  ;;  %v385_v26 = vpack.c.bf16 %v377_v24, %v376_v23  ;;  %p1057_p12 = pnand %p1056_p11, %p1204_p5  ;;  %p1064_p2 = por %p1063_p1, %p1062_p0 }
  0x2c   : > { %995 = vmatprep.subr.msk.bf16.mxu0 %vm462_vm0, %v380_v34 }
  0x2d   : > { %v497_v27 = vsel %vm462_vm0, %v385_v26, 0  ;;  %p1058_p13 = pneg %p1057_p12 }
  0x2e   : > { %614 = vperm.xlu0 %1041, %v584_v52  }
  0x2f   : > { %759 = vperm.xlu1 %1042, %v740_v55   ;;  %p1065_p3 = pnand %p1064_p2, %p1058_p13 }
  0x32   : > { %619 = vperm.xlu0 %1041, %v585_v56  }
  0x33   : > { %958 = vmatpush3.bf16.xpose.msra.mxu0 %v482_v45  ;;  %764 = vperm.xlu1 %1042, %v741_v60  }
  0x34   : > { %996 = vmatprep.subr.msk.bf16.mxu0 %vm462_vm0, %v381_v46 }
  0x36   : > { %624 = vperm.xlu0 %1041, %v586_v0  }
  0x37   : > { %769 = vperm.xlu1 %1042, %v742_v3  }
  0x3a   : > { %629 = vperm.xlu0 %1041, %v587_v4   ;;  %v1048_v4 = vld [vmem:[%s1431_s4 + $0x8] sm:$0xff]  }
  0x3b   : > { %960 = vmatpush3.bf16.xpose.msra.mxu0 %v485_v57  ;;  %774 = vperm.xlu1 %1042, %v743_v8  }
  0x3c   : > { %997 = vmatprep.subr.msk.bf16.mxu0 %vm462_vm0, %v382_v58 }
  0x3e   : > { %779 = vperm.xlu0 %1041, %v744_v12  }
  0x3f   : > { %784 = vperm.xlu1 %1042, %v745_v15  }
  0x42   : > { %810 = vperm.xlu0 %1041, %v746_v16  }
  0x43   : > { %962 = vmatpush3.bf16.xpose.msra.mxu0 %v488_v5  ;;  %v1049_v5 = vld [vmem:[%s1431_s4 + $0x10] sm:$0xff]  }
  0x44   : > { %998 = vmatprep.subr.msk.bf16.mxu0 %vm462_vm0, %v383_v6  ;;  %v1050_v6 = vld [vmem:[%s1431_s4 + $0x18] sm:$0xff]  }
  0x4b   : > { %964 = vmatpush3.bf16.xpose.msra.mxu0 %v491_v17 }
  0x4c   : > { %999 = vmatprep.subr.msk.bf16.mxu0 %vm462_vm0, %v384_v18 }
  0x53   : > { %966 = vmatpush3.bf16.xpose.msra.mxu0 %v494_v25 }
  0x54   : > { %1000 = vmatprep.subr.msk.bf16.mxu0 %vm462_vm0, %v385_v26 }
  0x5b   : > { %968 = vmatpush3.bf16.xpose.msra.mxu0 %v497_v27 }
  0x62   : > { %970 = vmatmul.mubr.msk.bf16.vlgmr.msra.gmra.mrb[0].mxu0 %vm462_vm0, %v1044_v28 }
  0x63   : > { %973 = vmatprep.mubr.msk.bf16.mxu0 %vm462_vm0, %v1045_v29 }
  0x6a   : > { %974 = vmatmul.mubr.msk.bf16.gmra.mrb[4].mxu0 %vm462_vm0, %v1046_v30 }
  0x91   : > { %v405_v32 = vpop.permute.xlu0 %404 }
  0x92   : > { %v415_v33 = vpop.permute.xlu1 %414 }
  0x95   : > { %v410_v34 = vpop.permute.xlu0 %409 }
  0x96   : > { %v420_v35 = vpop.permute.xlu1 %419 }
  0x99   : > { %v425_v39 = vpop.permute.xlu0 %424 }
  0x9a   : > { %v430_v44 = vpop.permute.xlu1 %429 }
  0x9d   : > { %v435_v51 = vpop.permute.xlu0 %434 }
  0x9e   : > { %v440_v56 = vpop.permute.xlu1 %439 }
  0xa1   : > { %v595_v7 = vpop.permute.xlu0 %594 }
  0xa2   : > { %v600_v8 = vpop.permute.xlu1 %599 }
  0xa5   : > { %v605_v9 = vpop.permute.xlu0 %604 }
  0xa6   : > { %v610_v10 = vpop.permute.xlu1 %609 }
  0xa9   : > { %v750_v11 = vpop.permute.xlu0 %749 }
  0xaa   : > { %v755_v12 = vpop.permute.xlu1 %754 }
  0xad   : > { %v615_v13 = vpop.permute.xlu0 %614 }
  0xae   : > { %v760_v14 = vpop.permute.xlu1 %759 }
  0xb1   : > { %v620_v15 = vpop.permute.xlu0 %619 }
  0xb2   : > { %v765_v17 = vpop.permute.xlu1 %764 }
  0xb5   : > { %v625_v26 = vpop.permute.xlu0 %624 }
  0xb6   : > { %v770_v29 = vpop.permute.xlu1 %769 }
 0x135   : > { %v971_v36 = vpop.f32.mrb[0].mxu0 }
 0x136   : > { %v542_v37 = vadd.f32 %v971_v36, %v415_v33  ;;  %v533_v38 = vpop.f32.mrb[1].mxu0 }
 0x137   : > { %v534_v40 = vadd.f32 %v533_v38, %v405_v32  ;;  %v972_v41 = vpop.f32.mrb[2].mxu0 }
 0x138   : > { %v545_v42 = vadd.f32 %v972_v41, %v420_v35  ;;  %v536_v43 = vpop.f32.mrb[3].mxu0  ;;  %v566_v46 = vmax.f32 %v542_v37, 0.0 }
 0x139   : > { %v537_v45 = vadd.f32 %v536_v43, %v410_v34  ;;  %v564_v48 = vmax.f32 %v534_v40, 0.0  ;;  %v630_v40 = vpop.permute.xlu0 %629 }
 0x13a   : > { %v567_v47 = vmax.f32 %v545_v42, 0.0 }
 0x13b   : > { %v565_v49 = vmax.f32 %v537_v45, 0.0 }
 0x13c   : > { %v589_v50 = vpack.c.bf16 %v567_v47, %v566_v46  ;;  %v775_v47 = vpop.permute.xlu1 %774 }
 0x13d   : > { %v975_v52 = vpop.f32.mrb[4].mxu0  ;;  %v588_v53 = vpack.c.bf16 %v565_v49, %v564_v48 }
 0x13e   : > { %v558_v54 = vadd.f32 %v975_v52, %v435_v51  ;;  %v549_v55 = vpop.f32.mrb[5].mxu0 }
 0x13f   : > { %v550_v57 = vadd.f32 %v549_v55, %v425_v39  ;;  %v976_v58 = vpop.f32.mrb[6].mxu0  ;;  %977 = vmatprep.subr.bf16.mxu1 %v588_v53  ;;  %v780_v55 = vpop.permute.xlu0 %779 }
 0x140   : > { %v561_v59 = vadd.f32 %v976_v58, %v440_v56  ;;  %v552_v60 = vpop.f32.mrb[7].mxu0  ;;  %978 = vmatpush3.bf16.msra.mxu1 %v588_v53  ;;  %v570_v62 = vmax.f32 %v558_v54, 0.0  ;;  %v785_v58 = vpop.permute.xlu1 %784 }
 0x141   : > { %v553_v61 = vadd.f32 %v552_v60, %v430_v44  ;;  %979 = vmatprep.subr.bf16.mxu1 %v589_v50  ;;  %v568_v0 = vmax.f32 %v550_v57, 0.0 }
 0x142   : > { %v571_v63 = vmax.f32 %v561_v59, 0.0 }
 0x143   : > { %v569_v1 = vmax.f32 %v553_v61, 0.0  ;;  %v813_v61 = vlaneseq }
 0x144   : > { %v591_v2 = vpack.c.bf16 %v571_v63, %v570_v62  ;;  %980 = vmatpush3.bf16.msra.mxu1 %v589_v50 }
 0x145   : > { %v590_v3 = vpack.c.bf16 %v569_v1, %v568_v0  ;;  %v814_v0 = vshrl.u32 %v813_v61, 7 }
 0x147   : > { %981 = vmatprep.subr.bf16.mxu1 %v590_v3 }
 0x148   : > { %982 = vmatpush3.bf16.msra.mxu1 %v590_v3  ;;  %v815_v3 = vsub.s32 0, %v814_v0 }
 0x149   : > { %983 = vmatprep.subr.bf16.mxu1 %v591_v2 }
 0x14c   : > { %984 = vmatpush3.bf16.msra.mxu1 %v591_v2 }
 0x14f   : > { %986 = vmatmul.mubr.msk.bf16.vlgmr.msra.gmra.mrb[0].mxu1 %vm652_vm1, %v1048_v4 }
 0x150   : > { %989 = vmatprep.mubr.msk.bf16.mxu1 %vm652_vm1, %v1049_v5  ;;  %v811_v5 = vpop.permute.xlu0 %810 }
 0x157   : > { %990 = vmatmul.mubr.msk.bf16.gmra.mrb[4].mxu1 %vm652_vm1, %v1050_v6 }
 0x222   : > { %v987_v16 = vpop.f32.mrb[0].mxu1 }
 0x223   : > { %v699_v18 = vpop.f32.mrb[1].mxu1  ;;  %v708_v19 = vadd.f32 %v987_v16, %v605_v9 }
 0x224   : > { %v700_v20 = vadd.f32 %v699_v18, %v595_v7  ;;  %v988_v21 = vpop.f32.mrb[2].mxu1  ;;  %v816_v7 = vrot.slane %v811_v5, %v815_v3 }
 0x225   : > { %v711_v22 = vadd.f32 %v988_v21, %v610_v10  ;;  %v702_v23 = vpop.f32.mrb[3].mxu1  ;;  %v732_v27 = vmax.f32 %v708_v19, 0.0 }
 0x226   : > { %v730_v24 = vmax.f32 %v700_v20, 0.0  ;;  %v703_v25 = vadd.f32 %v702_v23, %v600_v8 }
 0x227   : > { %v733_v30 = vmax.f32 %v711_v22, 0.0  ;;  %v789_v35 = vmul.f32 %v760_v14, %v732_v27 }
 0x228   : > { %v731_v28 = vmax.f32 %v703_v25, 0.0  ;;  %v787_v31 = vmul.f32 %v750_v11, %v730_v24 }
 0x229   : > { %v790_v41 = vmul.f32 %v765_v17, %v733_v30 }
 0x22a   : > { %v788_v32 = vmul.f32 %v755_v12, %v731_v28  ;;  %v991_v33 = vpop.f32.mrb[4].mxu1 }
 0x22b   : > { %v715_v34 = vpop.f32.mrb[5].mxu1  ;;  %v724_v37 = vadd.f32 %v991_v33, %v625_v26 }
 0x22c   : > { %v795_v36 = vadd.f32 %v788_v32, %v787_v31  ;;  %v716_v38 = vadd.f32 %v715_v34, %v615_v13  ;;  %v992_v39 = vpop.f32.mrb[6].mxu1 }
 0x22d   : > { %v718_v42 = vpop.f32.mrb[7].mxu1  ;;  %v727_v45 = vadd.f32 %v992_v39, %v630_v40  ;;  %v736_v48 = vmax.f32 %v724_v37, 0.0 }
 0x22e   : > { %v796_v43 = vadd.f32 %v795_v36, %v789_v35  ;;  %v734_v44 = vmax.f32 %v716_v38, 0.0  ;;  %v719_v46 = vadd.f32 %v718_v42, %v620_v15 }
 0x22f   : > { %v737_v53 = vmax.f32 %v727_v45, 0.0  ;;  %v793_v56 = vmul.f32 %v780_v55, %v736_v48 }
 0x230   : > { %v791_v49 = vmul.f32 %v770_v29, %v734_v44  ;;  %v797_v50 = vadd.f32 %v796_v43, %v790_v41  ;;  %v735_v51 = vmax.f32 %v719_v46, 0.0 }
 0x231   : > { %v794_v59 = vmul.f32 %v785_v58, %v737_v53 }
 0x232   : > { %v798_v52 = vadd.f32 %v797_v50, %v791_v49  ;;  %v792_v54 = vmul.f32 %v775_v47, %v735_v51 }
 0x234   : > { %v799_v57 = vadd.f32 %v798_v52, %v792_v54 }
 0x236   : > { %v800_v60 = vadd.f32 %v799_v57, %v793_v56 }
 0x238   : > { %v801_v62 = vadd.f32 %v800_v60, %v794_v59 }
 0x23a   : > { %v802_v63 = vrot.slane %v801_v62, 4 }
 0x23c   : > { %v803_v1 = vadd.f32 %v802_v63, %v801_v62 }
 0x23e   : > { %v804_v2 = vrot.slane %v803_v1, 2 }
 0x240   : > { %v805_v4 = vadd.f32 %v804_v2, %v803_v1 }
 0x242   : > { %v806_v6 = vrot.slane %v805_v4, 1 }
 0x244   : > { %v807_v8 = vadd.f32 %v806_v6, %v805_v4 }
 0x246   : > { %v817_v9 = vadd.f32 %v816_v7, %v807_v8 }
 0x248   : > { %v929_v10 = vmul.f32 -1.442695, %v817_v9 }
 0x24a   : > { %1051 = vpow2.f32 %v929_v10 }
 0x254   : > { %v1052_v11 = vpop.eup %1051 }
 0x255   : > { %v821_v12 = vadd.f32 1.0, %v1052_v11 }
 0x257   : > { %1053 = vrcp.f32 %v821_v12 }
 0x261   : > { %v1054_v13 = vpop.eup %1053 }
 0x262   : > { %824 = vst [vmem:[%s316_s28] sm:$0x1] %v1054_v13 }
 0x263   : > { %1068 = shalt.err (!%p1065_p3)
}
 0x264   : > { %s1069_s18 = scalar_lea.hbm %s1385_s13, 16  ;;  %s1073_s26 = scalar_lea.hbm %s1435_s8, 32 }
 0x265   : > { %p1070_p4 = scmp.ne.s32.totalorder %s1385_s13, %s1069_s18  ;;  %p1074_p9 = scmp.lt.u32.totalorder %s1385_s13, %s1435_s8 }
 0x266   : > { %p1075_p10 = scmp.lt.u32.totalorder %s1073_s26, %s1069_s18  ;;  %p1077_p12 = scmp.lt.u32.totalorder %s1069_s18, %s1385_s13 }
 0x267   : > { %p1071_p7 = pnand %p1070_p4, %p1204_p5 }
 0x268   : > { %p1076_p11 = por %p1075_p10, %p1074_p9 }
 0x269   : > { %p1072_p8 = pneg %p1071_p7 }
 0x26a   : > { %p1078_p13 = por %p1077_p12, %p1076_p11 }
 0x26c   : > { %p1079_p0 = pnand %p1078_p13, %p1072_p8 }
 0x26e   : > { %1082 = shalt.err (!%p1079_p0)
}
 0x26f   : > { %1001 = dma.vmem_to_hbm [thread:$0]  (%p1204_p5), %s1387_s7, 16, %s1385_s13, %s826_s19  }
 0x270 PF: > { %p1007_p1 = scmp.ge.s32.totalorder %s1117_s10, 2  ;;  %s850_s14 = sand.u32 1, %s1105_s29  }
 0x271   : > { %s851_s11 = scalar_lea.sflag [#allocation4], %s850_s14 }
 0x272   : > { %p1004_p2 = pnand %p1007_p1, %p1208_p6 }
 0x274   : > { %1100 = dma.done.wait (!%p1004_p2), %s851_s11, 16  }
 0x275   : > { %1102 = vsyncadd (!%p1004_p2), %s851_s11, 4294967280  ;;  %p20_p3 = scmp.ge.s32.totalorder %s1192_s12, 4   ;;  %s1438_s29 = smov %s1109_s30 }
 0x276   : > { %s1439_s30 = smov %s1113_s9  ;;  %s1440_s9 = smov %s1202_s15 }
 0x277   : > { %s1441_s10 = smov %s1192_s12  ;;  %22 = sbr.rel (!%p20_p3) target bundleno = 6 (0x6), region = 90 }
 0x27e   :  { %855 = vsyncpa [#allocation4], 1 }
 0x27f   :  { %857 = vsyncpa [#allocation4 + $0x1], 1 }

</bundles_post_ra>
